<compile_context>
chip_gen: v7x
topology: tpu7x:2x2x1
jax: 0.10.0
libtpu: 0.0.40
codegen_flags: <defaults>
</compile_context>

<pallas_src>
import functools

import jax
import jax.numpy as jnp
from jax import lax
from jax.experimental import pallas as pl
from jax.experimental.pallas import tpu as pltpu


def _cdiv(a, b):
    return -(-a // b)


def _sq_err_sum_kernel(pred_ref, target_ref, out_ref, *,
                       B, L, tB, tL, nbpc, need_row_mask, need_col_mask):
    c = pl.program_id(0)   # parallel slice (TensorCore on v7x)
    j = pl.program_id(1)   # feature-tile axis (reduction)
    i = pl.program_id(2)   # batch-tile axis, innermost (reduction)

    @pl.when(jnp.logical_and(j == 0, i == 0))
    def _():
        out_ref[...] = jnp.zeros_like(out_ref)

    # Upcast inside the kernel; math + accumulation in f32.
    d = pred_ref[...].astype(jnp.float32) - target_ref[...].astype(jnp.float32)
    sq = d * d

    def _rowsum(x):
        # Splitting the sublane dim at multiples of 8 is layout-preserving, so
        # this lowers to a stack of VPU vector adds into an (8, tL) vreg slab.
        if tB % 8 == 0:
            return x.reshape(tB // 8, 8, tL).sum(axis=0)     # (8, tL)
        return x.sum(axis=0, keepdims=True)                   # (1, tL)

    if not (need_row_mask or need_col_mask):
        out_ref[...] += _rowsum(sq)
        return

    tile_idx = c * nbpc + i            # un-clamped (phantoms index past the end)
    row_edge = ((tile_idx + 1) * tB > B) if need_row_mask else None
    col_edge = ((j + 1) * tL > L) if need_col_mask else None
    if row_edge is not None and col_edge is not None:
        edge = jnp.logical_or(row_edge, col_edge)
    elif row_edge is not None:
        edge = row_edge
    else:
        edge = col_edge

    @pl.when(jnp.logical_not(edge))          # interior fast path: no mask VALU
    def _():
        out_ref[...] += _rowsum(sq)

    @pl.when(edge)                           # ragged / phantom tiles only
    def _():
        mask = None
        if need_row_mask:
            rows = tile_idx * tB + lax.broadcasted_iota(jnp.int32, (tB, 1), 0)
            mask = rows < B                  # all-False for phantom tiles
        if need_col_mask:
            cols = j * tL + lax.broadcasted_iota(jnp.int32, (1, tL), 1)
            cmask = cols < L
            mask = cmask if mask is None else jnp.logical_and(mask, cmask)
        out_ref[...] += _rowsum(jnp.where(mask, sq, 0.0))


def _chip_config():
    """Generation-specific tiling budget / core split."""
    kind = ""
    try:
        kind = jax.devices()[0].device_kind.lower()
    except Exception:
        pass
    if "v7" in kind:
        # 2 TC/chip, ~3.2 TB/s HBM, 64 MiB physical VMEM (32 MiB scoped default)
        return dict(num_tc=2, budget_bytes=44 << 20, vmem_limit_bytes=50 << 20)
    if "v6" in kind or "trillium" in kind:
        # 1 TC, 128 MiB VMEM, 32 MiB scoped default -> ~4 MiB f32 blocks
        return dict(num_tc=1, budget_bytes=28 << 20, vmem_limit_bytes=None)
    if "v5e" in kind or "v5 lite" in kind or "v5lite" in kind:
        # 1 TC, 16 MiB scoped default -> ~2 MiB blocks, already HBM-roofline
        return dict(num_tc=1, budget_bytes=14 << 20, vmem_limit_bytes=None)
    # Unknown chip (v4/v5p/interpret): conservative, fits any scoped default.
    return dict(num_tc=1, budget_bytes=12 << 20, vmem_limit_bytes=None)


def _select_tiles(B, L, isz_pred, isz_tgt, budget_bytes):
    # Sublane packing unit: 8 rows for 4-byte, 16 for 2-byte, 32 for 1-byte.
    sub = max(8, 32 // max(1, min(isz_pred, isz_tgt)))
    max_tl = 4096
    if L <= max_tl:
        tL = L
    else:
        # Multiple of 128 that divides L evenly when possible, so the column
        # mask (and its per-step VALU cost) disappears for nice shapes.
        nl = _cdiv(L, max_tl)
        tL = 128 * _cdiv(_cdiv(L, 128), nl)
    # Per-element VMEM cost of one grid step: double-buffered native-dtype
    # input blocks plus ~3 f32 elementwise temporaries (diff/square/reduce).
    per_elem = 2 * (isz_pred + isz_tgt) + 12
    rows = max(1, budget_bytes // max(1, tL * per_elem))
    if B <= max(rows, sub):
        tB = B                                    # single full-dim batch block
    else:
        tB = max(sub, (min(rows, B) // sub) * sub)
    return tB, tL


def mse_weighted(pred, target, *, tile_b=None, tile_l=None):
    """weight_type='mean' path of MSE_weighted."""
    assert pred.shape == target.shape and pred.ndim == 2
    B, L = target.shape
    isz_p = jnp.dtype(pred.dtype).itemsize
    isz_t = jnp.dtype(target.dtype).itemsize

    cfg = _chip_config()
    tB, tL = _select_tiles(B, L, isz_p, isz_t, cfg["budget_bytes"])
    if tile_b is not None:
        tB = tile_b
    if tile_l is not None:
        tL = tile_l
    if tB != B:
        assert tB % 8 == 0, "tile_b must be a multiple of 8 or the full batch dim"
    if tL != L:
        assert tL % 128 == 0, "tile_l must be a multiple of 128 or the full feature dim"

    nb_total = _cdiv(B, tB)               # real batch tiles
    nl = _cdiv(L, tL)                     # feature tiles
    # Only split the batch-tile range across a parallel axis on 2-TC chips
    # (on v5e/v6e it is just a serial loop that would add phantom-tile work).
    C = 2 if (cfg["num_tc"] > 1 and nb_total > 1) else 1
    nbpc = _cdiv(nb_total, C)             # batch tiles per parallel slice

    need_row_mask = (C * nbpc * tB != B)  # covers ragged B and phantom tiles
    need_col_mask = (nl * tL != L)
    acc_rows = 8 if tB % 8 == 0 else 1    # acc_rows==1 implies C==1 (tB==B)

    kernel = functools.partial(
        _sq_err_sum_kernel,
        B=B, L=L, tB=tB, tL=tL, nbpc=nbpc,
        need_row_mask=need_row_mask, need_col_mask=need_col_mask)

    def in_map(c, j, i):
        # Clamp phantom tiles (nb_total % C != 0) onto the last real tile.
        # With the batch-tile axis innermost the clamped index equals the
        # previous step's block index, so Pallas reuses the resident buffer
        # instead of re-fetching; the kernel's row mask zeroes its contribution.
        return (jnp.minimum(c * nbpc + i, nb_total - 1), j)

    out_itemsize = 4
    partials = pl.pallas_call(
        kernel,
        out_shape=jax.ShapeDtypeStruct((C * acc_rows, tL), jnp.float32),
        grid_spec=pltpu.PrefetchScalarGridSpec(
            num_scalar_prefetch=0,
            grid=(C, nl, nbpc),                   # batch-tile axis innermost
            in_specs=[
                pl.BlockSpec((tB, tL), in_map),   # pred tile (native dtype)
                pl.BlockSpec((tB, tL), in_map),   # target tile (native dtype)
            ],
            # Per-parallel-slice, lane-dense f32 accumulator block; resident
            # across both reduction axes.
            out_specs=pl.BlockSpec((acc_rows, tL), lambda c, j, i: (c, 0)),
        ),
        compiler_params=pltpu.CompilerParams(
            dimension_semantics=("parallel", "arbitrary", "arbitrary"),
            vmem_limit_bytes=cfg["vmem_limit_bytes"],
        ),
        cost_estimate=pl.CostEstimate(
            flops=3 * B * L,
            transcendentals=0,
            bytes_accessed=B * L * (isz_p + isz_t)
                           + C * acc_rows * tL * out_itemsize,
        ),
    )(pred, target)

    # torch.mean((pred-target)^2 * (1/L)) == sum((pred-target)^2) / (B*L*L)
    return (jnp.sum(partials) / (B * L * L)).astype(jnp.float32)


# TODO(synk): weight_type='dynamic' builds per-sample weights with host-side
# numpy (np.where / np.log2 over a python loop); that data-dependent host logic
# has no clean Pallas equivalent, so only the default 'mean' path is implemented.


if __name__ == "__main__":
    key = jax.random.PRNGKey(0)
    k1, k2, k3, k4 = jax.random.split(key, 4)

    # Main check at the module's implied (N, features) 2-D convention.
    B, L = 8, 128
    pred = jax.random.normal(k1, (B, L), dtype=jnp.float32)
    target = jax.random.normal(k2, (B, L), dtype=jnp.float32)
    loss = mse_weighted(pred, target)
    jax.block_until_ready(loss)
    w_ref = jnp.ones((1, L), dtype=jnp.float32) / float(L)
    ref = jnp.mean((pred - target) ** 2 * w_ref)
    assert jnp.allclose(loss, ref, rtol=1e-5, atol=1e-6), (loss, ref)

    # Exercise the multi-tile / edge-masked / (possibly dual-slice) path with
    # forced tiny tiles: ragged B -> partial last tile (+ phantom tile on v7x).
    B2, L2 = 20, 384
    p2 = jax.random.normal(k3, (B2, L2), dtype=jnp.float32)
    t2 = jax.random.normal(k4, (B2, L2), dtype=jnp.float32)
    loss2 = mse_weighted(p2, t2, tile_b=8, tile_l=128)
    jax.block_until_ready(loss2)
    ref2 = jnp.mean((p2 - t2) ** 2 * (jnp.ones((1, L2), jnp.float32) / float(L2)))
    assert jnp.allclose(loss2, ref2, rtol=1e-5, atol=1e-6), (loss2, ref2)

    # bf16 inputs stream in their native dtype; math/accumulation stay f32.
    B3, L3 = 16, 256
    p3 = jax.random.normal(k1, (B3, L3), dtype=jnp.bfloat16)
    t3 = jax.random.normal(k2, (B3, L3), dtype=jnp.bfloat16)
    loss3 = mse_weighted(p3, t3)
    jax.block_until_ready(loss3)
    d3 = p3.astype(jnp.float32) - t3.astype(jnp.float32)
    ref3 = jnp.mean(d3 * d3) / float(L3)
    assert jnp.allclose(loss3, ref3, rtol=1e-5, atol=1e-6), (loss3, ref3)

    print("KERNEL_OK")
</pallas_src>

<mosaic_0001>
module attributes {stable_mosaic.version = 11 : i64} {
  func.func @_sq_err_sum_kernel(%arg0: i32, %arg1: i32, %arg2: i32, %arg3: memref<8x128xf32, #tpu.memory_space<vmem>>, %arg4: memref<8x128xf32, #tpu.memory_space<vmem>>, %arg5: memref<8x128xf32, #tpu.memory_space<vmem>>) attributes {dimension_semantics = [#tpu.dimension_semantics<parallel>, #tpu.dimension_semantics<arbitrary>, #tpu.dimension_semantics<arbitrary>], iteration_bounds = array<i64: 1, 1, 1>, scalar_prefetch = 0 : i64, scratch_operands = 0 : i64, tpu.core_type = #tpu.core_type<tc>, window_params = [{transform_indices = @transform_0, window_bounds = array<i64: 8, 128>}, {transform_indices = @transform_1, window_bounds = array<i64: 8, 128>}, {transform_indices = @transform_2, window_bounds = array<i64: 8, 128>}]} {
    %c0_i32 = arith.constant 0 : i32
    %0 = arith.cmpi eq, %arg1, %c0_i32 : i32
    %c0_i32_0 = arith.constant 0 : i32
    %1 = arith.cmpi eq, %arg2, %c0_i32_0 : i32
    %2 = arith.andi %0, %1 : i1
    %3 = arith.extui %2 : i1 to i32
    %c0_i32_1 = arith.constant 0 : i32
    %4 = arith.cmpi ne, %3, %c0_i32_1 : i32
    scf.if %4 {
      %cst_9 = arith.constant 0.000000e+00 : f32
      %14 = vector.broadcast %cst_9 : f32 to vector<8x128xf32>
      %c0_10 = arith.constant 0 : index
      %c0_11 = arith.constant 0 : index
      %15 = vector.load %arg5[%c0_10, %c0_11] : memref<8x128xf32, #tpu.memory_space<vmem>>, vector<8x128xf32>
      tpu.vector_store %arg5[%c0_10, %c0_11], %14 {strides = array<i32>} : memref<8x128xf32, #tpu.memory_space<vmem>>, vector<8x128xf32>,
    } else {
    }
    %c0 = arith.constant 0 : index
    %c0_2 = arith.constant 0 : index
    %5 = vector.load %arg3[%c0, %c0_2] : memref<8x128xf32, #tpu.memory_space<vmem>>, vector<8x128xf32>
    %c0_3 = arith.constant 0 : index
    %c0_4 = arith.constant 0 : index
    %6 = vector.load %arg4[%c0_3, %c0_4] : memref<8x128xf32, #tpu.memory_space<vmem>>, vector<8x128xf32>
    %7 = arith.subf %5, %6 : vector<8x128xf32>
    %8 = arith.mulf %7, %7 : vector<8x128xf32>
    %c0_5 = arith.constant 0 : index
    %c0_6 = arith.constant 0 : index
    %9 = vector.load %arg5[%c0_5, %c0_6] : memref<8x128xf32, #tpu.memory_space<vmem>>, vector<8x128xf32>
    %10 = vector.shape_cast %8 : vector<8x128xf32> to vector<1x8x128xf32>
    %cst = arith.constant dense<0.000000e+00> : vector<8x128xf32>
    %11 = vector.multi_reduction <add>, %10, %cst [0] : vector<1x8x128xf32> to vector<8x128xf32>
    %12 = arith.addf %9, %11 : vector<8x128xf32>
    %c0_7 = arith.constant 0 : index
    %c0_8 = arith.constant 0 : index
    %13 = vector.load %arg5[%c0_7, %c0_8] : memref<8x128xf32, #tpu.memory_space<vmem>>, vector<8x128xf32>
    tpu.vector_store %arg5[%c0_7, %c0_8], %12 {strides = array<i32>} : memref<8x128xf32, #tpu.memory_space<vmem>>, vector<8x128xf32>,
    return
  }
  func.func @transform_0(%arg0: i32, %arg1: i32, %arg2: i32) -> (i32, i32) {
    %c1_i32 = arith.constant 1 : i32
    %0 = arith.muli %arg0, %c1_i32 : i32
    %1 = arith.addi %0, %arg2 : i32
    %c0_i32 = arith.constant 0 : i32
    %2 = arith.minsi %1, %c0_i32 : i32
    %c0_i32_0 = arith.constant 0 : i32
    return %2, %arg1 : i32, i32
  }
  func.func @transform_1(%arg0: i32, %arg1: i32, %arg2: i32) -> (i32, i32) {
    %c1_i32 = arith.constant 1 : i32
    %0 = arith.muli %arg0, %c1_i32 : i32
    %1 = arith.addi %0, %arg2 : i32
    %c0_i32 = arith.constant 0 : i32
    %2 = arith.minsi %1, %c0_i32 : i32
    %c0_i32_0 = arith.constant 0 : i32
    return %2, %arg1 : i32, i32
  }
  func.func @transform_2(%arg0: i32, %arg1: i32, %arg2: i32) -> (i32, i32) {
    %c0_i32 = arith.constant 0 : i32
    %c0_i32_0 = arith.constant 0 : i32
    return %arg0, %c0_i32 : i32, i32
  }
}

</mosaic_0001>

<bundles_post_ra>
// kernel: tpu_custom_call.1
= control target key start
LH: loop header
LB: loop body
LE: loop exit
PB: predicated region body
PF: predicated region fallthrough
CT: control target
= control target key end

     0   :  { %7 = vsyncpa [#allocation3], 0  ;;  %s217_s0 = inlined_call_operand.hbm [shape: f32[8,128], index: 0, kind: input, shape index: {}]   ;;  %s218_s1 = inlined_call_operand.hbm [shape: f32[8,128], index: 1, kind: input, shape index: {}]   ;;  %s219_s2 = inlined_call_operand.hbm [shape: f32[8,128], index: 2, kind: output, shape index: {}]  }
   0x1   :  { %8 = vsyncpa [#allocation6], 0 }
   0x2   :  { %9 = vsyncpa [#allocation4], 0  ;;  %s163_s9 = smov [#allocation2]   ;;  %s164_s11 = smov [#allocation5]  }
   0x3   :  { %s21_s10 = sshll.u32 %s163_s9, 4  ;;  %s36_s12 = sshll.u32 %s164_s11, 4  ;;  %s22_s10 = int_to_ptr.vmem [resolvable:$true] %s21_s10  ;;  %s37_s12 = int_to_ptr.vmem [resolvable:$true] %s36_s12 }
   0x4   :  { %s91_s15 = scalar_lea.hbm %s217_s0, 128 }
   0x5   :  { %p92_p0 = scmp.ne.s32.totalorder %s217_s0, %s91_s15  ;;  %p95_p1 = scmp.lt.u32.totalorder %s91_s15, %s217_s0 }
   0x7   :  { %p97_p2 = pnand %p95_p1, %p92_p0 }
   0x9   :  { %100 = shalt.err (!%p97_p2)
}
   0xa   :  { %s101_s20 = scalar_lea.vmem %s22_s10, 128  ;;  %p106_p4 = scmp.lt.s32.totalorder %s22_s10, %s22_s10 }
   0xb   :  { %p102_p3 = scmp.ne.s32.totalorder %s22_s10, %s101_s20  ;;  %p107_p5 = scmp.lt.s32.totalorder %s101_s20, %s101_s20 }
   0xd   :  { %p108_p6 = por %p107_p5, %p106_p4 }
   0xf   :  { %p109_p7 = pnand %p108_p6, %p102_p3 }
  0x11   :  { %112 = shalt.err (!%p109_p7)
}
  0x12   :  { %24 = dma.hbm_to_vmem [thread:$0]  %s217_s0, 128, %s22_s10, [#allocation3]  }
  0x13   :  { %s113_s25 = scalar_lea.hbm %s218_s1, 128 }
  0x14   :  { %p114_p8 = scmp.ne.s32.totalorder %s218_s1, %s113_s25  ;;  %p117_p9 = scmp.lt.u32.totalorder %s113_s25, %s218_s1 }
  0x16   :  { %p119_p10 = pnand %p117_p9, %p114_p8 }
  0x18   :  { %122 = shalt.err (!%p119_p10)
}
  0x19   :  { %s123_s30 = scalar_lea.vmem %s37_s12, 128  ;;  %p128_p12 = scmp.lt.s32.totalorder %s37_s12, %s37_s12 }
  0x1a   :  { %p124_p11 = scmp.ne.s32.totalorder %s37_s12, %s123_s30  ;;  %p129_p13 = scmp.lt.s32.totalorder %s123_s30, %s123_s30 }
  0x1c   :  { %p130_p0 = por %p129_p13, %p128_p12 }
  0x1e   :  { %p131_p1 = pnand %p130_p0, %p124_p11 }
  0x20   :  { %134 = shalt.err (!%p131_p1)
}
  0x21   :  { %39 = dma.hbm_to_vmem [thread:$0]  %s218_s1, 128, %s37_s12, [#allocation6]  }
  0x22   :  { %157 = dma.done.wait [#allocation3], 128  }
  0x23   :  { %158 = vsyncadd [#allocation3], 4294967168 }
  0x24   :  { %159 = dma.done.wait [#allocation6], 128  }
  0x25   :  { %160 = vsyncadd [#allocation6], 4294967168  ;;  %v59_v0 = vld [vmem:[#allocation2] sm:$0xff]  ;;  %v60_v1 = vld [vmem:[#allocation5] sm:$0xff]  ;;  %s165_s4 = smov [#allocation7]  }
  0x26   :  { %v61_v2 = vsub.f32 %v59_v0, %v60_v1  ;;  %s73_s5 = sshll.u32 %s165_s4, 4  ;;  %s74_s5 = int_to_ptr.vmem [resolvable:$true] %s73_s5 }
  0x27   :  { %s135_s6 = scalar_lea.vmem %s74_s5, 128  ;;  %p140_p3 = scmp.lt.s32.totalorder %s74_s5, %s74_s5 }
  0x28   :  { %v62_v3 = vmul.f32 %v61_v2, %v61_v2  ;;  %p136_p2 = scmp.ne.s32.totalorder %s74_s5, %s135_s6  ;;  %p141_p4 = scmp.lt.s32.totalorder %s135_s6, %s135_s6 }
  0x2a   :  { %66 = vst [vmem:[#allocation7] sm:$0xff] %v62_v3  ;;  %p142_p5 = por %p141_p4, %p140_p3 }
  0x2c   :  { %p143_p6 = pnand %p142_p5, %p136_p2 }
  0x2e   :  { %146 = shalt.err (!%p143_p6)
}
  0x2f   :  { %s147_s8 = scalar_lea.hbm %s219_s2, 128 }
  0x30   :  { %p148_p7 = scmp.ne.s32.totalorder %s219_s2, %s147_s8  ;;  %p151_p8 = scmp.lt.u32.totalorder %s147_s8, %s219_s2 }
  0x32   :  { %p153_p9 = pnand %p151_p8, %p148_p7 }
  0x34   :  { %156 = shalt.err (!%p153_p9)
}
  0x35   :  { %76 = dma.vmem_to_hbm [thread:$0]  %s74_s5, 128, %s219_s2, [#allocation4]  }
  0x36   :  { %161 = dma.done.wait [#allocation4], 128  }
  0x37   :  { %162 = vsyncadd [#allocation4], 4294967168 }
  0x38   :  { %80 = vsyncpa [#allocation3], 1 }
  0x39   :  { %81 = vsyncpa [#allocation6], 1 }
  0x3a   :  { %82 = vsyncpa [#allocation4], 1 }

</bundles_post_ra>
